<compile_context>
chip_gen: v5e
topology: v5e:2x2
jax: 0.10.0
libtpu: 0.0.40
codegen_flags: <defaults>
</compile_context>

<pallas_src>
import functools

import jax
import jax.numpy as jnp
from jax.experimental import pallas as pl
from jax.experimental.pallas import tpu as pltpu


def _round_up(v, m):
    return ((v + m - 1) // m) * m


def _conv_out_len(l_in, kernel=3, stride=1):
    return (l_in - kernel) // stride + 1


def _elu(x):
    # ELU(alpha=1): x if x > 0 else exp(x) - 1  (clamp exp arg for safety)
    return jnp.where(x > 0, x, jnp.exp(jnp.minimum(x, 0.0)) - 1.0)


# --------------------------------------------------------------------------
# Kernel
# --------------------------------------------------------------------------
def surname_cnn_kernel(
    x_ref,                        # (TB, L0*C_in)              f32
    w1_ref, b1_ref,               # (L0*C_in, L1*C), (1, L1*C)  w: compute_dtype, b: f32
    w2_ref, b2_ref,               # (L1*C,   L2*C), (1, L2*C)
    w3_ref, b3_ref,               # (L2*C,   L3*C), (1, L3*C)
    w4_ref, b4_ref,               # (L3*C,      C), (1,    C)
    wfc_ref, bfc_ref,             # (C, NCLS_pad),  (1, NCLS_pad)
    out_ref,                      # (TB, NCLS_pad)              f32
    *,
    num_classes,                  # static int (un-padded)
    apply_activator,              # static bool
    compute_dtype,                # static dtype for MXU operands
):
    h = x_ref[...].astype(compute_dtype)                     # (TB, L0*C_in)

    # Four conv layers, each a single block-sparse matmul on packed layout.
    for w_ref, b_ref in ((w1_ref, b1_ref), (w2_ref, b2_ref),
                         (w3_ref, b3_ref), (w4_ref, b4_ref)):
        acc = jnp.dot(h, w_ref[...], preferred_element_type=jnp.float32)
        acc = _elu(acc + b_ref[...])                          # bias + ELU in f32
        h = acc.astype(compute_dtype)                         # carry in compute_dtype

    # After layer 4 the packed layout is (TB, 1*C) == features (squeeze(dim=2)).
    logits = jnp.dot(h, wfc_ref[...], preferred_element_type=jnp.float32)
    logits = logits + bfc_ref[...]                            # (TB, NCLS_pad)

    if apply_activator:
        # Softmax over the real classes only (padded lanes masked out).
        col = jax.lax.broadcasted_iota(jnp.int32, logits.shape, 1)
        valid = col < num_classes
        masked = jnp.where(valid, logits, -1e30)
        m = jnp.max(masked, axis=1, keepdims=True)
        e = jnp.where(valid, jnp.exp(masked - m), 0.0)
        denom = jnp.sum(e, axis=1, keepdims=True)
        logits = e * pl.reciprocal(denom, approx=True)

    out_ref[...] = logits.astype(out_ref.dtype)


# --------------------------------------------------------------------------
# Wrapper
# --------------------------------------------------------------------------
def _pack_conv_as_matmul(w, b, l_in, stride, dtype):
    """Conv1d(k=3) weight -> block-sparse matmul weight on packed (L*C) layout."""
    c_out, c_in, k = w.shape
    l_out = _conv_out_len(l_in, k, stride)
    w_big = jnp.zeros((l_in * c_in, l_out * c_out), jnp.float32)
    for j in range(l_out):
        for kk in range(k):
            l = j * stride + kk
            w_big = w_big.at[l * c_in:(l + 1) * c_in,
                             j * c_out:(j + 1) * c_out].set(w[:, :, kk].T)
    b_big = jnp.tile(b.astype(jnp.float32), l_out).reshape(1, l_out * c_out)
    return w_big.astype(dtype), b_big, l_out


def surname_cnn_forward(x_ncl, params, apply_activator=False,
                        compute_dtype=jnp.bfloat16, batch_tile=256):
    """x_ncl: (B, C_in, L) float32, PyTorch NCL layout."""
    batch, c_in, l0 = x_ncl.shape
    strides = (1, 2, 2, 1)
    (w1, b1), (w2, b2), (w3, b3), (w4, b4), (wfc, bfc) = params
    num_classes, c = wfc.shape
    ncls_pad = _round_up(num_classes, 128)                    # lane-dense output

    # ---- Glue (plain JAX, outside the kernel): weight & layout prep ----
    packed, l_cur = [], l0
    for (w, b), s in zip(((w1, b1), (w2, b2), (w3, b3), (w4, b4)), strides):
        wb, bb, l_cur = _pack_conv_as_matmul(w, b, l_cur, s, compute_dtype)
        packed.append((wb, bb))
    assert l_cur == 1, f"final conv length must be 1 for squeeze(dim=2), got {l_cur}"

    wfc_p = (jnp.zeros((c, ncls_pad), jnp.float32)
             .at[:, :num_classes].set(jnp.transpose(wfc, (1, 0)).astype(jnp.float32))
             .astype(compute_dtype))
    bfc_p = (jnp.zeros((1, ncls_pad), jnp.float32)
             .at[:, :num_classes].set(bfc.astype(jnp.float32)))

    # Packed, lane-dense input: (B, L0*C_in), element l*C_in + c = x[b, c, l].
    x_packed = jnp.transpose(x_ncl, (0, 2, 1)).reshape(batch, l0 * c_in)
    x_packed = x_packed.astype(jnp.float32)

    # Batch tiling: largest tile <= batch_tile that still yields >= 2 grid
    # steps of *real* work whenever batch > 8 (v7x 2-TC sharding), never an
    # all-padding extra step.
    tb_cap = _round_up(max(8, batch_tile), 8)
    tb_half = _round_up(max(1, (batch + 1) // 2), 8)
    tb = min(tb_cap, tb_half)
    b_pad = _round_up(batch, tb)
    if b_pad != batch:
        x_packed = jnp.pad(x_packed, ((0, b_pad - batch), (0, 0)))
    grid = (b_pad // tb,)

    kernel = functools.partial(
        surname_cnn_kernel,
        num_classes=num_classes,
        apply_activator=apply_activator,
        compute_dtype=compute_dtype,
    )

    weight_args = (packed[0][0], packed[0][1], packed[1][0], packed[1][1],
                   packed[2][0], packed[2][1], packed[3][0], packed[3][1],
                   wfc_p, bfc_p)

    in_specs = [pl.BlockSpec((tb, l0 * c_in), lambda i: (i, 0))]
    # Weights: full blocks, constant index -> DMA'd once, resident in VMEM.
    in_specs += [pl.BlockSpec(a.shape, lambda i: (0, 0)) for a in weight_args]

    # Advisory cost estimate for XLA scheduling around the custom call.
    mm_dims = [(packed[0][0].shape), (packed[1][0].shape), (packed[2][0].shape),
               (packed[3][0].shape), (wfc_p.shape)]
    flops = 2 * b_pad * sum(int(k) * int(n) for k, n in mm_dims)
    transcendentals = b_pad * sum(int(n) for _, n in mm_dims[:4])
    if apply_activator:
        transcendentals += b_pad * ncls_pad
    bytes_accessed = (int(x_packed.size) * x_packed.dtype.itemsize
                      + b_pad * ncls_pad * 4
                      + sum(int(a.size) * a.dtype.itemsize for a in weight_args))
    cost = pl.CostEstimate(flops=int(flops),
                           transcendentals=int(transcendentals),
                           bytes_accessed=int(bytes_accessed))

    out = pl.pallas_call(
        kernel,
        out_shape=jax.ShapeDtypeStruct((b_pad, ncls_pad), jnp.float32),
        grid=grid,
        in_specs=in_specs,
        out_specs=pl.BlockSpec((tb, ncls_pad), lambda i: (i, 0)),
        compiler_params=pltpu.CompilerParams(
            dimension_semantics=("parallel",),
            vmem_limit_bytes=32 * 1024 * 1024),     # headroom; safe on v7x 64 MiB parts
        cost_estimate=cost,
    )(x_packed, *weight_args)

    return out[:batch, :num_classes]


# --------------------------------------------------------------------------
# Pure-JAX reference (PyTorch semantics: NCL conv, VALID padding)
# --------------------------------------------------------------------------
def reference_forward(x_ncl, params, apply_activator=False):
    (w1, b1), (w2, b2), (w3, b3), (w4, b4), (wfc, bfc) = params
    strides = (1, 2, 2, 1)
    h = x_ncl
    for (w, b, s) in zip((w1, w2, w3, w4), (b1, b2, b3, b4), strides):
        h = jax.lax.conv_general_dilated(
            h, w, window_strides=(s,), padding="VALID",
            dimension_numbers=("NCH", "OIH", "NCH"),
        )
        h = h + b[None, :, None]
        h = _elu(h)
    feat = h[:, :, 0]                       # squeeze(dim=2)
    logits = feat @ wfc.T + bfc[None, :]
    if apply_activator:
        logits = jax.nn.softmax(logits, axis=1)
    return logits


def init_params(key, initial_num_channels, num_classes, num_channels):
    """Deterministic synthetic init (PyTorch-like uniform(-1/sqrt(fan_in), ...))."""
    def uniform(k, shape, fan_in):
        bound = 1.0 / jnp.sqrt(jnp.float32(fan_in))
        return jax.random.uniform(k, shape, jnp.float32, -bound, bound)

    keys = jax.random.split(key, 10)
    c0, c, ncls = initial_num_channels, num_channels, num_classes
    w1 = uniform(keys[0], (c, c0, 3), c0 * 3); b1 = uniform(keys[1], (c,), c0 * 3)
    w2 = uniform(keys[2], (c, c, 3), c * 3);   b2 = uniform(keys[3], (c,), c * 3)
    w3 = uniform(keys[4], (c, c, 3), c * 3);   b3 = uniform(keys[5], (c,), c * 3)
    w4 = uniform(keys[6], (c, c, 3), c * 3);   b4 = uniform(keys[7], (c,), c * 3)
    wfc = uniform(keys[8], (ncls, c), c);      bfc = uniform(keys[9], (ncls,), c)
    return ((w1, b1), (w2, b2), (w3, b3), (w4, b4), (wfc, bfc))


if __name__ == "__main__":
    # Small shapes consistent with the module: seq length 18 collapses to 1
    # after the four convs (18 -> 16 -> 7 -> 3 -> 1).
    batch = 2
    initial_num_channels = 8
    num_channels = 32
    num_classes = 10
    seq_len = 18

    key = jax.random.PRNGKey(0)
    k_x, k_p = jax.random.split(key)
    x = jax.random.normal(k_x, (batch, initial_num_channels, seq_len), jnp.float32)
    params = init_params(k_p, initial_num_channels, num_classes, num_channels)

    ref = reference_forward(x, params, apply_activator=False)

    # 1) f32 MXU operands: tight check against the pure-JAX reference.
    out_f32 = jax.block_until_ready(
        surname_cnn_forward(x, params, apply_activator=False,
                            compute_dtype=jnp.float32))
    assert out_f32.shape == (batch, num_classes)
    assert jnp.allclose(out_f32, ref, atol=5e-3, rtol=5e-3), "f32 mismatch vs reference"

    # 2) bf16 MXU operands (perf path): looser tolerance.
    out_bf16 = jax.block_until_ready(
        surname_cnn_forward(x, params, apply_activator=False,
                            compute_dtype=jnp.bfloat16))
    assert jnp.allclose(out_bf16, ref, atol=5e-2, rtol=5e-2), "bf16 mismatch vs reference"

    # 3) Softmax (apply_activator=True) path with masked, lane-padded classes.
    out_sm = jax.block_until_ready(
        surname_cnn_forward(x, params, apply_activator=True,
                            compute_dtype=jnp.bfloat16))
    ref_sm = reference_forward(x, params, apply_activator=True)
    assert jnp.allclose(out_sm, ref_sm, atol=5e-2, rtol=5e-2), "softmax mismatch"

    print("KERNEL_OK")
</pallas_src>

<mosaic_0001>
module attributes {stable_mosaic.version = 11 : i64} {
  func.func @surname_cnn_kernel(%arg0: i32, %arg1: memref<8x144xf32, #tpu.memory_space<vmem>>, %arg2: memref<144x512xf32, #tpu.memory_space<vmem>>, %arg3: memref<1x512xf32, #tpu.memory_space<vmem>>, %arg4: memref<512x224xf32, #tpu.memory_space<vmem>>, %arg5: memref<1x224xf32, #tpu.memory_space<vmem>>, %arg6: memref<224x96xf32, #tpu.memory_space<vmem>>, %arg7: memref<1x96xf32, #tpu.memory_space<vmem>>, %arg8: memref<96x32xf32, #tpu.memory_space<vmem>>, %arg9: memref<1x32xf32, #tpu.memory_space<vmem>>, %arg10: memref<32x128xf32, #tpu.memory_space<vmem>>, %arg11: memref<1x128xf32, #tpu.memory_space<vmem>>, %arg12: memref<8x128xf32, #tpu.memory_space<vmem>>) attributes {dimension_semantics = [#tpu.dimension_semantics<parallel>], iteration_bounds = array<i64: 1>, scalar_prefetch = 0 : i64, scratch_operands = 0 : i64, tpu.core_type = #tpu.core_type<tc>, window_params = [{transform_indices = @transform_0, window_bounds = array<i64: 8, 144>}, {pipeline_mode = #tpu.pipeline_mode<synchronous>, transform_indices = @transform_1, window_bounds = array<i64: 144, 512>}, {pipeline_mode = #tpu.pipeline_mode<synchronous>, transform_indices = @transform_2, window_bounds = array<i64: 1, 512>}, {pipeline_mode = #tpu.pipeline_mode<synchronous>, transform_indices = @transform_3, window_bounds = array<i64: 512, 224>}, {pipeline_mode = #tpu.pipeline_mode<synchronous>, transform_indices = @transform_4, window_bounds = array<i64: 1, 224>}, {pipeline_mode = #tpu.pipeline_mode<synchronous>, transform_indices = @transform_5, window_bounds = array<i64: 224, 96>}, {pipeline_mode = #tpu.pipeline_mode<synchronous>, transform_indices = @transform_6, window_bounds = array<i64: 1, 96>}, {pipeline_mode = #tpu.pipeline_mode<synchronous>, transform_indices = @transform_7, window_bounds = array<i64: 96, 32>}, {pipeline_mode = #tpu.pipeline_mode<synchronous>, transform_indices = @transform_8, window_bounds = array<i64: 1, 32>}, {pipeline_mode = #tpu.pipeline_mode<synchronous>, transform_indices = @transform_9, window_bounds = array<i64: 32, 128>}, {pipeline_mode = #tpu.pipeline_mode<synchronous>, transform_indices = @transform_10, window_bounds = array<i64: 1, 128>}, {transform_indices = @transform_11, window_bounds = array<i64: 8, 128>}]} {
    %c0 = arith.constant 0 : index
    %c0_0 = arith.constant 0 : index
    %0 = vector.load %arg1[%c0, %c0_0] : memref<8x144xf32, #tpu.memory_space<vmem>>, vector<8x144xf32>
    %c0_1 = arith.constant 0 : index
    %c0_2 = arith.constant 0 : index
    %1 = vector.load %arg2[%c0_1, %c0_2] : memref<144x512xf32, #tpu.memory_space<vmem>>, vector<144x512xf32>
    %cst = arith.constant dense<0.000000e+00> : vector<8x512xf32>
    %2 = tpu.matmul %0, %1, %cst {dimension_numbers = #tpu.dot_dimension_numbers<[1], [0], [0], [1], [0, 0, 1, 1], [], []>} : vector<8x144xf32>, vector<144x512xf32>, vector<8x512xf32> -> vector<8x512xf32>
    %c0_3 = arith.constant 0 : index
    %c0_4 = arith.constant 0 : index
    %3 = vector.load %arg3[%c0_3, %c0_4] : memref<1x512xf32, #tpu.memory_space<vmem>>, vector<1x512xf32>
    %4 = vector.broadcast %3 : vector<1x512xf32> to vector<8x512xf32>
    %5 = arith.addf %2, %4 : vector<8x512xf32>
    %cst_5 = arith.constant 0.000000e+00 : f32
    %6 = vector.broadcast %cst_5 : f32 to vector<8x512xf32>
    %7 = arith.cmpf ogt, %5, %6 : vector<8x512xf32>
    %cst_6 = arith.constant 0.000000e+00 : f32
    %8 = vector.broadcast %cst_6 : f32 to vector<8x512xf32>
    %9 = arith.minimumf %5, %8 : vector<8x512xf32>
    %10 = math.exp %9 : vector<8x512xf32>
    %cst_7 = arith.constant 1.000000e+00 : f32
    %11 = vector.broadcast %cst_7 : f32 to vector<8x512xf32>
    %12 = arith.subf %10, %11 : vector<8x512xf32>
    %13 = arith.select %7, %5, %12 : vector<8x512xi1>, vector<8x512xf32>
    %c0_8 = arith.constant 0 : index
    %c0_9 = arith.constant 0 : index
    %14 = vector.load %arg4[%c0_8, %c0_9] : memref<512x224xf32, #tpu.memory_space<vmem>>, vector<512x224xf32>
    %cst_10 = arith.constant dense<0.000000e+00> : vector<8x224xf32>
    %15 = tpu.matmul %13, %14, %cst_10 {dimension_numbers = #tpu.dot_dimension_numbers<[1], [0], [0], [1], [0, 0, 1, 1], [], []>} : vector<8x512xf32>, vector<512x224xf32>, vector<8x224xf32> -> vector<8x224xf32>
    %c0_11 = arith.constant 0 : index
    %c0_12 = arith.constant 0 : index
    %16 = vector.load %arg5[%c0_11, %c0_12] : memref<1x224xf32, #tpu.memory_space<vmem>>, vector<1x224xf32>
    %17 = vector.broadcast %16 : vector<1x224xf32> to vector<8x224xf32>
    %18 = arith.addf %15, %17 : vector<8x224xf32>
    %cst_13 = arith.constant 0.000000e+00 : f32
    %19 = vector.broadcast %cst_13 : f32 to vector<8x224xf32>
    %20 = arith.cmpf ogt, %18, %19 : vector<8x224xf32>
    %cst_14 = arith.constant 0.000000e+00 : f32
    %21 = vector.broadcast %cst_14 : f32 to vector<8x224xf32>
    %22 = arith.minimumf %18, %21 : vector<8x224xf32>
    %23 = math.exp %22 : vector<8x224xf32>
    %cst_15 = arith.constant 1.000000e+00 : f32
    %24 = vector.broadcast %cst_15 : f32 to vector<8x224xf32>
    %25 = arith.subf %23, %24 : vector<8x224xf32>
    %26 = arith.select %20, %18, %25 : vector<8x224xi1>, vector<8x224xf32>
    %c0_16 = arith.constant 0 : index
    %c0_17 = arith.constant 0 : index
    %27 = vector.load %arg6[%c0_16, %c0_17] : memref<224x96xf32, #tpu.memory_space<vmem>>, vector<224x96xf32>
    %cst_18 = arith.constant dense<0.000000e+00> : vector<8x96xf32>
    %28 = tpu.matmul %26, %27, %cst_18 {dimension_numbers = #tpu.dot_dimension_numbers<[1], [0], [0], [1], [0, 0, 1, 1], [], []>} : vector<8x224xf32>, vector<224x96xf32>, vector<8x96xf32> -> vector<8x96xf32>
    %c0_19 = arith.constant 0 : index
    %c0_20 = arith.constant 0 : index
    %29 = vector.load %arg7[%c0_19, %c0_20] : memref<1x96xf32, #tpu.memory_space<vmem>>, vector<1x96xf32>
    %30 = vector.broadcast %29 : vector<1x96xf32> to vector<8x96xf32>
    %31 = arith.addf %28, %30 : vector<8x96xf32>
    %cst_21 = arith.constant 0.000000e+00 : f32
    %32 = vector.broadcast %cst_21 : f32 to vector<8x96xf32>
    %33 = arith.cmpf ogt, %31, %32 : vector<8x96xf32>
    %cst_22 = arith.constant 0.000000e+00 : f32
    %34 = vector.broadcast %cst_22 : f32 to vector<8x96xf32>
    %35 = arith.minimumf %31, %34 : vector<8x96xf32>
    %36 = math.exp %35 : vector<8x96xf32>
    %cst_23 = arith.constant 1.000000e+00 : f32
    %37 = vector.broadcast %cst_23 : f32 to vector<8x96xf32>
    %38 = arith.subf %36, %37 : vector<8x96xf32>
    %39 = arith.select %33, %31, %38 : vector<8x96xi1>, vector<8x96xf32>
    %c0_24 = arith.constant 0 : index
    %c0_25 = arith.constant 0 : index
    %40 = vector.load %arg8[%c0_24, %c0_25] : memref<96x32xf32, #tpu.memory_space<vmem>>, vector<96x32xf32>
    %cst_26 = arith.constant dense<0.000000e+00> : vector<8x32xf32>
    %41 = tpu.matmul %39, %40, %cst_26 {dimension_numbers = #tpu.dot_dimension_numbers<[1], [0], [0], [1], [0, 0, 1, 1], [], []>} : vector<8x96xf32>, vector<96x32xf32>, vector<8x32xf32> -> vector<8x32xf32>
    %c0_27 = arith.constant 0 : index
    %c0_28 = arith.constant 0 : index
    %42 = vector.load %arg9[%c0_27, %c0_28] : memref<1x32xf32, #tpu.memory_space<vmem>>, vector<1x32xf32>
    %43 = vector.broadcast %42 : vector<1x32xf32> to vector<8x32xf32>
    %44 = arith.addf %41, %43 : vector<8x32xf32>
    %cst_29 = arith.constant 0.000000e+00 : f32
    %45 = vector.broadcast %cst_29 : f32 to vector<8x32xf32>
    %46 = arith.cmpf ogt, %44, %45 : vector<8x32xf32>
    %cst_30 = arith.constant 0.000000e+00 : f32
    %47 = vector.broadcast %cst_30 : f32 to vector<8x32xf32>
    %48 = arith.minimumf %44, %47 : vector<8x32xf32>
    %49 = math.exp %48 : vector<8x32xf32>
    %cst_31 = arith.constant 1.000000e+00 : f32
    %50 = vector.broadcast %cst_31 : f32 to vector<8x32xf32>
    %51 = arith.subf %49, %50 : vector<8x32xf32>
    %52 = arith.select %46, %44, %51 : vector<8x32xi1>, vector<8x32xf32>
    %c0_32 = arith.constant 0 : index
    %c0_33 = arith.constant 0 : index
    %53 = vector.load %arg10[%c0_32, %c0_33] : memref<32x128xf32, #tpu.memory_space<vmem>>, vector<32x128xf32>
    %cst_34 = arith.constant dense<0.000000e+00> : vector<8x128xf32>
    %54 = tpu.matmul %52, %53, %cst_34 {dimension_numbers = #tpu.dot_dimension_numbers<[1], [0], [0], [1], [0, 0, 1, 1], [], []>} : vector<8x32xf32>, vector<32x128xf32>, vector<8x128xf32> -> vector<8x128xf32>
    %c0_35 = arith.constant 0 : index
    %c0_36 = arith.constant 0 : index
    %55 = vector.load %arg11[%c0_35, %c0_36] : memref<1x128xf32, #tpu.memory_space<vmem>>, vector<1x128xf32>
    %56 = vector.broadcast %55 : vector<1x128xf32> to vector<8x128xf32>
    %57 = arith.addf %54, %56 : vector<8x128xf32>
    %c0_37 = arith.constant 0 : index
    %c0_38 = arith.constant 0 : index
    %58 = vector.load %arg12[%c0_37, %c0_38] : memref<8x128xf32, #tpu.memory_space<vmem>>, vector<8x128xf32>
    tpu.vector_store %arg12[%c0_37, %c0_38], %57 {strides = array<i32>} : memref<8x128xf32, #tpu.memory_space<vmem>>, vector<8x128xf32>,
    return
  }
  func.func @transform_0(%arg0: i32) -> (i32, i32) {
    %c0_i32 = arith.constant 0 : i32
    %c0_i32_0 = arith.constant 0 : i32
    return %arg0, %c0_i32 : i32, i32
  }
  func.func @transform_1(%arg0: i32) -> (i32, i32) {
    %c0_i32 = arith.constant 0 : i32
    %c0_i32_0 = arith.constant 0 : i32
    %c0_i32_1 = arith.constant 0 : i32
    return %c0_i32, %c0_i32_0 : i32, i32
  }
  func.func @transform_2(%arg0: i32) -> (i32, i32) {
    %c0_i32 = arith.constant 0 : i32
    %c0_i32_0 = arith.constant 0 : i32
    %c0_i32_1 = arith.constant 0 : i32
    return %c0_i32, %c0_i32_0 : i32, i32
  }
  func.func @transform_3(%arg0: i32) -> (i32, i32) {
    %c0_i32 = arith.constant 0 : i32
    %c0_i32_0 = arith.constant 0 : i32
    %c0_i32_1 = arith.constant 0 : i32
    return %c0_i32, %c0_i32_0 : i32, i32
  }
  func.func @transform_4(%arg0: i32) -> (i32, i32) {
    %c0_i32 = arith.constant 0 : i32
    %c0_i32_0 = arith.constant 0 : i32
    %c0_i32_1 = arith.constant 0 : i32
    return %c0_i32, %c0_i32_0 : i32, i32
  }
  func.func @transform_5(%arg0: i32) -> (i32, i32) {
    %c0_i32 = arith.constant 0 : i32
    %c0_i32_0 = arith.constant 0 : i32
    %c0_i32_1 = arith.constant 0 : i32
    return %c0_i32, %c0_i32_0 : i32, i32
  }
  func.func @transform_6(%arg0: i32) -> (i32, i32) {
    %c0_i32 = arith.constant 0 : i32
    %c0_i32_0 = arith.constant 0 : i32
    %c0_i32_1 = arith.constant 0 : i32
    return %c0_i32, %c0_i32_0 : i32, i32
  }
  func.func @transform_7(%arg0: i32) -> (i32, i32) {
    %c0_i32 = arith.constant 0 : i32
    %c0_i32_0 = arith.constant 0 : i32
    %c0_i32_1 = arith.constant 0 : i32
    return %c0_i32, %c0_i32_0 : i32, i32
  }
  func.func @transform_8(%arg0: i32) -> (i32, i32) {
    %c0_i32 = arith.constant 0 : i32
    %c0_i32_0 = arith.constant 0 : i32
    %c0_i32_1 = arith.constant 0 : i32
    return %c0_i32, %c0_i32_0 : i32, i32
  }
  func.func @transform_9(%arg0: i32) -> (i32, i32) {
    %c0_i32 = arith.constant 0 : i32
    %c0_i32_0 = arith.constant 0 : i32
    %c0_i32_1 = arith.constant 0 : i32
    return %c0_i32, %c0_i32_0 : i32, i32
  }
  func.func @transform_10(%arg0: i32) -> (i32, i32) {
    %c0_i32 = arith.constant 0 : i32
    %c0_i32_0 = arith.constant 0 : i32
    %c0_i32_1 = arith.constant 0 : i32
    return %c0_i32, %c0_i32_0 : i32, i32
  }
  func.func @transform_11(%arg0: i32) -> (i32, i32) {
    %c0_i32 = arith.constant 0 : i32
    %c0_i32_0 = arith.constant 0 : i32
    return %arg0, %c0_i32 : i32, i32
  }
}

</mosaic_0001>

<bundles_post_ra>
// kernel: tpu_custom_call.1
= control target key start
LH: loop header
LB: loop body
LE: loop exit
PB: predicated region body
PF: predicated region fallthrough
CT: control target
= control target key end

     0   :  { %vm123_vm0 = vcmask 130048   ;;  %s1689_s0 = inlined_call_operand.vmem [shape: f32[8,144], index: 0, kind: input, shape index: {}]   ;;  %s1690_s1 = inlined_call_operand.vmem [shape: f32[144,512], index: 1, kind: input, shape index: {}]   ;;  %s1691_s2 = inlined_call_operand.vmem [shape: f32[1,512], index: 2, kind: input, shape index: {}]   ;;  %s1692_s3 = inlined_call_operand.vmem [shape: f32[512,224], index: 3, kind: input, shape index: {}]   ;;  %s1693_s4 = inlined_call_operand.vmem [shape: f32[1,224], index: 4, kind: input, shape index: {}]   ;;  %s1694_s5 = inlined_call_operand.vmem [shape: f32[224,96], index: 5, kind: input, shape index: {}]   ;;  %s1695_s6 = inlined_call_operand.vmem [shape: f32[1,96], index: 6, kind: input, shape index: {}]   ;;  %s1696_s7 = inlined_call_operand.vmem [shape: f32[96,32], index: 7, kind: input, shape index: {}]   ;;  %s1697_s8 = inlined_call_operand.vmem [shape: f32[1,32], index: 8, kind: input, shape index: {}]   ;;  %s1698_s9 = inlined_call_operand.vmem [shape: f32[32,128], index: 9, kind: input, shape index: {}]   ;;  %s1699_s10 = inlined_call_operand.vmem [shape: f32[1,128], index: 10, kind: input, shape index: {}]   ;;  %s1700_s11 = inlined_call_operand.hbm [shape: f32[8,128], index: 11, kind: output, shape index: {}]  }
   0x1   :  { %v101_v0 = vld [vmem:[%s1690_s1 + $0x1e0] sm:$0xff]  ;;  %v102_v2 = vld [vmem:[%s1690_s1 + $0x1e8] sm:$0xff]  ;;  %v103_v8 = vld [vmem:[%s1690_s1 + $0x1f0] sm:$0xff] }
   0x2   :  { %v109_v1 = vld [vmem:[%s1690_s1 + $0x220] sm:$0xff]  ;;  %127 = vmatpush.msra.mxu0 %v101_v0  ;;  %v110_v3 = vld [vmem:[%s1690_s1 + $0x228] sm:$0xff]  ;;  %167 = vmatpush.msra.mxu2 %v102_v2  ;;  %v111_v9 = vld [vmem:[%s1690_s1 + $0x230] sm:$0xff] }
   0x3   :  { %161 = vmatpush.msra.mxu1 %v109_v1  ;;  %v97_v4 = vld [vmem:[%s1690_s1 + $0x1c0] sm:$0xff]  ;;  %201 = vmatpush.msra.mxu3 %v110_v3  ;;  %v98_v6 = vld [vmem:[%s1690_s1 + $0x1c8] sm:$0xff]  ;;  %v99_v12 = vld [vmem:[%s1690_s1 + $0x1d0] sm:$0xff] }
   0x4   :  { %v105_v5 = vld [vmem:[%s1690_s1 + $0x200] sm:$0xff]  ;;  %v106_v7 = vld [vmem:[%s1690_s1 + $0x208] sm:$0xff]  ;;  %128 = vmatpush.msra.mxu0 %v97_v4  ;;  %168 = vmatpush.msra.mxu2 %v98_v6  ;;  %v107_v13 = vld [vmem:[%s1690_s1 + $0x210] sm:$0xff] }
   0x5   :  { %162 = vmatpush.msra.mxu1 %v105_v5  ;;  %v93_v10 = vld [vmem:[%s1690_s1 + $0x1a0] sm:$0xff]  ;;  %v94_v11 = vld [vmem:[%s1690_s1 + $0x1a8] sm:$0xff]  ;;  %202 = vmatpush.msra.mxu3 %v106_v7  ;;  %v95_v17 = vld [vmem:[%s1690_s1 + $0x1b0] sm:$0xff] }
   0x6   :  { %v89_v14 = vld [vmem:[%s1690_s1 + $0x180] sm:$0xff]  ;;  %v90_v15 = vld [vmem:[%s1690_s1 + $0x188] sm:$0xff]  ;;  %129 = vmatpush.msra.mxu0 %v93_v10  ;;  %169 = vmatpush.msra.mxu2 %v94_v11  ;;  %v104_v18 = vld [vmem:[%s1690_s1 + $0x1f8] sm:$0xff] }
   0x7   :  { %207 = vmatpush.msrb.mxu1 %v103_v8  ;;  %241 = vmatpush.msrb.mxu3 %v111_v9  ;;  %v966_v16 = vld [vmem:[%s1689_s0 + $0x8] sm:$0xff]  ;;  %v85_v19 = vld [vmem:[%s1690_s1 + $0x160] sm:$0xff]  ;;  %v91_v21 = vld [vmem:[%s1690_s1 + $0x190] sm:$0xff] }
   0x8   :  { %130 = vmatpush.msra.mxu0 %v89_v14  ;;  %170 = vmatpush.msra.mxu2 %v90_v15  ;;  %v86_v20 = vld [vmem:[%s1690_s1 + $0x168] sm:$0xff]  ;;  %v100_v22 = vld [vmem:[%s1690_s1 + $0x1d8] sm:$0xff]  ;;  %v81_v23 = vld [vmem:[%s1690_s1 + $0x140] sm:$0xff] }
   0x9   :  { %208 = vmatpush.msrb.mxu1 %v99_v12  ;;  %242 = vmatpush.msrb.mxu3 %v107_v13  ;;  %v82_v24 = vld [vmem:[%s1690_s1 + $0x148] sm:$0xff]  ;;  %v87_v25 = vld [vmem:[%s1690_s1 + $0x170] sm:$0xff]  ;;  %v96_v26 = vld [vmem:[%s1690_s1 + $0x1b8] sm:$0xff] }
   0xa   :  { %794 = vmatmul.msk.f32.vlgmr.msra.gmra.mxu3 %vm123_vm0, %v966_v16  ;;  %131 = vmatpush.msra.mxu0 %v85_v19  ;;  %v77_v27 = vld [vmem:[%s1690_s1 + $0x120] sm:$0xff]  ;;  %v78_v28 = vld [vmem:[%s1690_s1 + $0x128] sm:$0xff]  ;;  %v83_v29 = vld [vmem:[%s1690_s1 + $0x150] sm:$0xff] }
   0xb   :  { %209 = vmatpush.msrb.mxu1 %v95_v17  ;;  %247 = vmatpush.msra.mxu3 %v104_v18  ;;  %v92_v30 = vld [vmem:[%s1690_s1 + $0x198] sm:$0xff]  ;;  %v73_v31 = vld [vmem:[%s1690_s1 + $0x100] sm:$0xff]  ;;  %v74_v32 = vld [vmem:[%s1690_s1 + $0x108] sm:$0xff] }
   0xc   :  { %171 = vmatpush.msra.mxu2 %v86_v20  ;;  %132 = vmatpush.msra.mxu0 %v81_v23  ;;  %v79_v33 = vld [vmem:[%s1690_s1 + $0x130] sm:$0xff]  ;;  %v88_v34 = vld [vmem:[%s1690_s1 + $0x178] sm:$0xff]  ;;  %v69_v35 = vld [vmem:[%s1690_s1 + $0xe0] sm:$0xff] }
   0xd   :  { %210 = vmatpush.msrb.mxu1 %v91_v21  ;;  %248 = vmatpush.msra.mxu3 %v100_v22  ;;  %v70_v36 = vld [vmem:[%s1690_s1 + $0xe8] sm:$0xff]  ;;  %v75_v37 = vld [vmem:[%s1690_s1 + $0x110] sm:$0xff]  ;;  %v84_v38 = vld [vmem:[%s1690_s1 + $0x158] sm:$0xff] }
   0xe   :  { %172 = vmatpush.msra.mxu2 %v82_v24  ;;  %133 = vmatpush.msra.mxu0 %v77_v27  ;;  %v65_v39 = vld [vmem:[%s1690_s1 + $0xc0] sm:$0xff]  ;;  %v66_v40 = vld [vmem:[%s1690_s1 + $0xc8] sm:$0xff]  ;;  %v71_v41 = vld [vmem:[%s1690_s1 + $0xf0] sm:$0xff] }
   0xf   :  { %211 = vmatpush.msrb.mxu1 %v87_v25  ;;  %249 = vmatpush.msra.mxu3 %v96_v26  ;;  %v80_v42 = vld [vmem:[%s1690_s1 + $0x138] sm:$0xff]  ;;  %v61_v43 = vld [vmem:[%s1690_s1 + $0xa0] sm:$0xff]  ;;  %v62_v44 = vld [vmem:[%s1690_s1 + $0xa8] sm:$0xff] }
  0x10   :  { %173 = vmatpush.msra.mxu2 %v78_v28  ;;  %134 = vmatpush.msra.mxu0 %v73_v31  ;;  %v67_v45 = vld [vmem:[%s1690_s1 + $0xd0] sm:$0xff]  ;;  %v76_v46 = vld [vmem:[%s1690_s1 + $0x118] sm:$0xff]  ;;  %v57_v47 = vld [vmem:[%s1690_s1 + $0x80] sm:$0xff] }
  0x11   :  { %212 = vmatpush.msrb.mxu1 %v83_v29  ;;  %250 = vmatpush.msra.mxu3 %v92_v30  ;;  %v58_v48 = vld [vmem:[%s1690_s1 + $0x88] sm:$0xff]  ;;  %v63_v49 = vld [vmem:[%s1690_s1 + $0xb0] sm:$0xff]  ;;  %v72_v50 = vld [vmem:[%s1690_s1 + $0xf8] sm:$0xff] }
  0x12   :  { %174 = vmatpush.msra.mxu2 %v74_v32  ;;  %135 = vmatpush.msra.mxu0 %v69_v35  ;;  %v53_v51 = vld [vmem:[%s1690_s1 + $0x60] sm:$0xff]  ;;  %v54_v52 = vld [vmem:[%s1690_s1 + $0x68] sm:$0xff]  ;;  %v59_v53 = vld [vmem:[%s1690_s1 + $0x90] sm:$0xff] }
  0x13   :  { %213 = vmatpush.msrb.mxu1 %v79_v33  ;;  %251 = vmatpush.msra.mxu3 %v88_v34  ;;  %v68_v54 = vld [vmem:[%s1690_s1 + $0xd8] sm:$0xff]  ;;  %v49_v55 = vld [vmem:[%s1690_s1 + $0x40] sm:$0xff]  ;;  %v50_v56 = vld [vmem:[%s1690_s1 + $0x48] sm:$0xff] }
  0x14   :  { %175 = vmatpush.msra.mxu2 %v70_v36  ;;  %136 = vmatpush.msra.mxu0 %v65_v39  ;;  %v64_v57 = vld [vmem:[%s1690_s1 + $0xb8] sm:$0xff]  ;;  %v55_v58 = vld [vmem:[%s1690_s1 + $0x70] sm:$0xff]  ;;  %v45_v59 = vld [vmem:[%s1690_s1 + $0x20] sm:$0xff] }
  0x15   :  { %214 = vmatpush.msrb.mxu1 %v75_v37  ;;  %252 = vmatpush.msra.mxu3 %v84_v38  ;;  %v46_v60 = vld [vmem:[%s1690_s1 + $0x28] sm:$0xff]  ;;  %v60_v61 = vld [vmem:[%s1690_s1 + $0x98] sm:$0xff]  ;;  %v51_v62 = vld [vmem:[%s1690_s1 + $0x50] sm:$0xff] }
  0x16   :  { %176 = vmatpush.msra.mxu2 %v66_v40  ;;  %137 = vmatpush.msra.mxu0 %v61_v43  ;;  %v41_v63 = vld [vmem:[%s1690_s1] sm:$0xff]  ;;  %v42_v0 = vld [vmem:[%s1690_s1 + $0x8] sm:$0xff]  ;;  %v56_v1 = vld [vmem:[%s1690_s1 + $0x78] sm:$0xff] }
  0x17   :  { %215 = vmatpush.msrb.mxu1 %v71_v41  ;;  %253 = vmatpush.msra.mxu3 %v80_v42  ;;  %v39_v2 = vld [vmem:[%s1689_s0] sm:$0xff] }
  0x18   :  { %177 = vmatpush.msra.mxu2 %v62_v44  ;;  %138 = vmatpush.msra.mxu0 %v57_v47 }
  0x19   :  { %216 = vmatpush.msrb.mxu1 %v67_v45  ;;  %254 = vmatpush.msra.mxu3 %v76_v46 }
  0x1a   :  { %178 = vmatpush.msra.mxu2 %v58_v48  ;;  %139 = vmatpush.msra.mxu0 %v53_v51 }
  0x1b   :  { %217 = vmatpush.msrb.mxu1 %v63_v49  ;;  %255 = vmatpush.msra.mxu3 %v72_v50 }
  0x1c   :  { %179 = vmatpush.msra.mxu2 %v54_v52  ;;  %140 = vmatpush.msra.mxu0 %v49_v55 }
  0x1d   :  { %218 = vmatpush.msrb.mxu1 %v59_v53  ;;  %256 = vmatpush.msra.mxu3 %v68_v54 }
  0x1e   :  { %793 = vmatmul.msk.f32.vlgmr.msra.gmra.mxu1 %vm123_vm0, %v966_v16  ;;  %180 = vmatpush.msra.mxu2 %v50_v56 }
  0x1f   :  { %257 = vmatpush.msra.mxu3 %v64_v57  ;;  %219 = vmatpush.msrb.mxu1 %v55_v58 }
  0x20   :  { %141 = vmatpush.msra.mxu0 %v45_v59  ;;  %181 = vmatpush.msra.mxu2 %v46_v60 }
  0x21   :  { %258 = vmatpush.msra.mxu3 %v60_v61  ;;  %220 = vmatpush.msrb.mxu1 %v51_v62 }
  0x22   :  { %16 = vsyncpa [#allocation3], 0  ;;  %795 = vmatmul.msk.f32.vlgmr.msrb.gmra.mxu3 %vm123_vm0, %v966_v16  ;;  %142 = vmatpush.msra.mxu0 %v41_v63  ;;  %v47_v3 = vld [vmem:[%s1690_s1 + $0x30] sm:$0xff]  ;;  %v52_v4 = vld [vmem:[%s1690_s1 + $0x58] sm:$0xff]  ;;  %vm649_vm6 = vcmask 785408   ;;  %vm752_vm9 = vcmask 261120  }
  0x23   :  { %182 = vmatpush.msra.mxu2 %v42_v0  ;;  %259 = vmatpush.msra.mxu3 %v56_v1  ;;  %v341_v5 = vld [vmem:[%s1692_s3 + $0xf0] sm:$0xff]  ;;  %v48_v8 = vld [vmem:[%s1690_s1 + $0x38] sm:$0xff]  ;;  %v339_v9 = vld [vmem:[%s1692_s3 + $0xe0] sm:$0xff] }
  0x24   :  { %v405_v6 = vld [vmem:[%s1692_s3 + $0x2f0] sm:$0xff]  ;;  %143 = vmatmul.f32.vlgmr.msra.gmra.mxu0 %v39_v2  ;;  %183 = vmatmul.f32.vlgmr.msra.gmra.mxu2 %v39_v2  ;;  %v44_v10 = vld [vmem:[%s1690_s1 + $0x18] sm:$0xff]  ;;  %v403_v11 = vld [vmem:[%s1692_s3 + $0x2e0] sm:$0xff] }
  0x25   :  { %v43_v7 = vld [vmem:[%s1690_s1 + $0x10] sm:$0xff]  ;;  %221 = vmatpush.msrb.mxu1 %v47_v3  ;;  %260 = vmatpush.msra.mxu3 %v52_v4  ;;  %v112_v13 = vld [vmem:[%s1690_s1 + $0x238] sm:$0xff]  ;;  %v335_v15 = vld [vmem:[%s1692_s3 + $0xc0] sm:$0xff] }
  0x26   :  { %445 = vmatpush.msrb.mxu2 %v341_v5  ;;  %485 = vmatpush.msrb.mxu0 %v405_v6  ;;  %v337_v12 = vld [vmem:[%s1692_s3 + $0xd0] sm:$0xff]  ;;  %v108_v18 = vld [vmem:[%s1690_s1 + $0x218] sm:$0xff]  ;;  %v371_v19 = vld [vmem:[%s1692_s3 + $0x1e0] sm:$0xff] }
  0x27   :  { %222 = vmatpush.msrb.mxu1 %v43_v7  ;;  %261 = vmatpush.msra.mxu3 %v48_v8  ;;  %v373_v14 = vld [vmem:[%s1692_s3 + $0x1f0] sm:$0xff]  ;;  %v399_v21 = vld [vmem:[%s1692_s3 + $0x2c0] sm:$0xff]  ;;  %v342_v61 = vld [vmem:[%s1692_s3 + $0xf8] sm:$0xff] }
  0x28   :  { %223 = vmatmul.f32.vlgmr.msrb.gmra.mxu1 %v39_v2  ;;  %446 = vmatpush.msrb.mxu2 %v339_v9  ;;  %v401_v17 = vld [vmem:[%s1692_s3 + $0x2d0] sm:$0xff]  ;;  %v331_v23 = vld [vmem:[%s1692_s3 + $0xa0] sm:$0xff]  ;;  %v340_v1 = vld [vmem:[%s1692_s3 + $0xe8] sm:$0xff] }
  0x29   :  { %262 = vmatpush.msra.mxu3 %v44_v10  ;;  %486 = vmatpush.msrb.mxu0 %v403_v11  ;;  %v333_v20 = vld [vmem:[%s1692_s3 + $0xb0] sm:$0xff]  ;;  %v367_v25 = vld [vmem:[%s1692_s3 + $0x1c0] sm:$0xff]  ;;  %v406_v4 = vld [vmem:[%s1692_s3 + $0x2f8] sm:$0xff] }
  0x2a   :  { %263 = vmatmul.f32.vlgmr.msra.gmra.mxu3 %v39_v2  ;;  %447 = vmatpush.msrb.mxu2 %v337_v12  ;;  %v369_v22 = vld [vmem:[%s1692_s3 + $0x1d0] sm:$0xff]  ;;  %v395_v27 = vld [vmem:[%s1692_s3 + $0x2a0] sm:$0xff]  ;;  %v338_v5 = vld [vmem:[%s1692_s3 + $0xd8] sm:$0xff] }
  0x2b   :  { %281 = vmatpush.msrb.mxu3 %v112_v13  ;;  %465 = vmatpush.msra.mxu1 %v373_v14  ;;  %v397_v24 = vld [vmem:[%s1692_s3 + $0x2b0] sm:$0xff]  ;;  %v327_v29 = vld [vmem:[%s1692_s3 + $0x80] sm:$0xff]  ;;  %v404_v8 = vld [vmem:[%s1692_s3 + $0x2e8] sm:$0xff] }
  0x2c   :  { %448 = vmatpush.msrb.mxu2 %v335_v15  ;;  %487 = vmatpush.msrb.mxu0 %v401_v17  ;;  %v329_v26 = vld [vmem:[%s1692_s3 + $0x90] sm:$0xff]  ;;  %v363_v32 = vld [vmem:[%s1692_s3 + $0x1a0] sm:$0xff]  ;;  %v336_v9 = vld [vmem:[%s1692_s3 + $0xc8] sm:$0xff] }
  0x2d   :  { %282 = vmatpush.msrb.mxu3 %v108_v18  ;;  %466 = vmatpush.msra.mxu1 %v371_v19  ;;  %v365_v28 = vld [vmem:[%s1692_s3 + $0x1b0] sm:$0xff]  ;;  %v323_v33 = vld [vmem:[%s1692_s3 + $0x60] sm:$0xff]  ;;  %v374_v10 = vld [vmem:[%s1692_s3 + $0x1f8] sm:$0xff] }
  0x2e   :  { %449 = vmatpush.msrb.mxu2 %v333_v20  ;;  %488 = vmatpush.msrb.mxu0 %v399_v21  ;;  %v393_v30 = vld [vmem:[%s1692_s3 + $0x290] sm:$0xff]  ;;  %v359_v38 = vld [vmem:[%s1692_s3 + $0x180] sm:$0xff]  ;;  %v402_v12 = vld [vmem:[%s1692_s3 + $0x2d8] sm:$0xff] }
  0x2f   :  { %467 = vmatpush.msra.mxu1 %v369_v22  ;;  %v325_v31 = vld [vmem:[%s1692_s3 + $0x70] sm:$0xff]  ;;  %v435_v39 = vld [vmem:[%s1692_s3 + $0x3e0] sm:$0xff]  ;;  %v334_v13 = vld [vmem:[%s1692_s3 + $0xb8] sm:$0xff] }
  0x30   :  { %450 = vmatpush.msrb.mxu2 %v331_v23  ;;  %489 = vmatpush.msrb.mxu0 %v397_v24  ;;  %v361_v34 = vld [vmem:[%s1692_s3 + $0x190] sm:$0xff]  ;;  %v387_v40 = vld [vmem:[%s1692_s3 + $0x260] sm:$0xff]  ;;  %v372_v14 = vld [vmem:[%s1692_s3 + $0x1e8] sm:$0xff] }
  0x31   :  { %468 = vmatpush.msra.mxu1 %v367_v25  ;;  %v437_v35 = vld [vmem:[%s1692_s3 + $0x3f0] sm:$0xff]  ;;  %v319_v41 = vld [vmem:[%s1692_s3 + $0x40] sm:$0xff]  ;;  %v400_v17 = vld [vmem:[%s1692_s3 + $0x2c8] sm:$0xff] }
  0x32   :  { %796 = vmatmul.msk.f32.vlgmr.msrb.gmra.mxu3 %vm123_vm0, %v966_v16  ;;  %451 = vmatpush.msrb.mxu2 %v329_v26  ;;  %v391_v16 = vld [vmem:[%s1692_s3 + $0x280] sm:$0xff]  ;;  %v389_v36 = vld [vmem:[%s1692_s3 + $0x270] sm:$0xff]  ;;  %v332_v18 = vld [vmem:[%s1692_s3 + $0xa8] sm:$0xff] }
  0x33   :  { %490 = vmatpush.msrb.mxu0 %v395_v27  ;;  %469 = vmatpush.msra.mxu1 %v365_v28  ;;  %v321_v37 = vld [vmem:[%s1692_s3 + $0x50] sm:$0xff]  ;;  %v431_v45 = vld [vmem:[%s1692_s3 + $0x3c0] sm:$0xff]  ;;  %v370_v19 = vld [vmem:[%s1692_s3 + $0x1d8] sm:$0xff] }
  0x34   :  { %452 = vmatpush.msrb.mxu2 %v327_v29  ;;  %505 = vmatpush.msra.mxu3 %v437_v35  ;;  %v357_v42 = vld [vmem:[%s1692_s3 + $0x170] sm:$0xff]  ;;  %v355_v47 = vld [vmem:[%s1692_s3 + $0x160] sm:$0xff]  ;;  %v398_v21 = vld [vmem:[%s1692_s3 + $0x2b8] sm:$0xff] }
  0x35   :  { %491 = vmatpush.msrb.mxu0 %v393_v30  ;;  %470 = vmatpush.msra.mxu1 %v363_v32  ;;  %v433_v43 = vld [vmem:[%s1692_s3 + $0x3d0] sm:$0xff]  ;;  %v383_v48 = vld [vmem:[%s1692_s3 + $0x240] sm:$0xff]  ;;  %v330_v22 = vld [vmem:[%s1692_s3 + $0x98] sm:$0xff] }
  0x36   :  { %453 = vmatpush.msrb.mxu2 %v325_v31  ;;  %506 = vmatpush.msra.mxu3 %v435_v39  ;;  %v385_v44 = vld [vmem:[%s1692_s3 + $0x250] sm:$0xff]  ;;  %v315_v50 = vld [vmem:[%s1692_s3 + $0x20] sm:$0xff]  ;;  %v368_v23 = vld [vmem:[%s1692_s3 + $0x1c8] sm:$0xff] }
  0x37   :  { %492 = vmatpush.msrb.mxu0 %v391_v16  ;;  %471 = vmatpush.msra.mxu1 %v361_v34  ;;  %v317_v46 = vld [vmem:[%s1692_s3 + $0x30] sm:$0xff]  ;;  %v427_v53 = vld [vmem:[%s1692_s3 + $0x3a0] sm:$0xff]  ;;  %v396_v25 = vld [vmem:[%s1692_s3 + $0x2a8] sm:$0xff] }
  0x38   :  { %454 = vmatpush.msrb.mxu2 %v323_v33  ;;  %507 = vmatpush.msra.mxu3 %v433_v43  ;;  %v429_v49 = vld [vmem:[%s1692_s3 + $0x3b0] sm:$0xff]  ;;  %v351_v55 = vld [vmem:[%s1692_s3 + $0x140] sm:$0xff]  ;;  %v328_v26 = vld [vmem:[%s1692_s3 + $0x88] sm:$0xff] }
  0x39   :  { %493 = vmatpush.msrb.mxu0 %v389_v36  ;;  %472 = vmatpush.msra.mxu1 %v359_v38  ;;  %v353_v51 = vld [vmem:[%s1692_s3 + $0x150] sm:$0xff]  ;;  %v379_v56 = vld [vmem:[%s1692_s3 + $0x220] sm:$0xff]  ;;  %v366_v27 = vld [vmem:[%s1692_s3 + $0x1b8] sm:$0xff] }
  0x3a   :  { %455 = vmatpush.msrb.mxu2 %v321_v37  ;;  %508 = vmatpush.msra.mxu3 %v431_v45  ;;  %v381_v52 = vld [vmem:[%s1692_s3 + $0x230] sm:$0xff]  ;;  %v311_v57 = vld [vmem:[%s1692_s3] sm:$0xff]  ;;  %v394_v29 = vld [vmem:[%s1692_s3 + $0x298] sm:$0xff] }
  0x3b   :  { %494 = vmatpush.msrb.mxu0 %v387_v40  ;;  %473 = vmatpush.msra.mxu1 %v357_v42  ;;  %v313_v54 = vld [vmem:[%s1692_s3 + $0x10] sm:$0xff]  ;;  %v347_v62 = vld [vmem:[%s1692_s3 + $0x120] sm:$0xff]  ;;  %v326_v30 = vld [vmem:[%s1692_s3 + $0x78] sm:$0xff] }
  0x3c   :  { %456 = vmatpush.msrb.mxu2 %v319_v41  ;;  %509 = vmatpush.msra.mxu3 %v429_v49  ;;  %v349_v58 = vld [vmem:[%s1692_s3 + $0x130] sm:$0xff]  ;;  %v423_v63 = vld [vmem:[%s1692_s3 + $0x380] sm:$0xff]  ;;  %v364_v31 = vld [vmem:[%s1692_s3 + $0x1a8] sm:$0xff] }
  0x3d   :  { %495 = vmatpush.msrb.mxu0 %v385_v44  ;;  %474 = vmatpush.msra.mxu1 %v355_v47  ;;  %v425_v59 = vld [vmem:[%s1692_s3 + $0x390] sm:$0xff]  ;;  %v375_v0 = vld [vmem:[%s1692_s3 + $0x200] sm:$0xff]  ;;  %v392_v16 = vld [vmem:[%s1692_s3 + $0x288] sm:$0xff] }
  0x3e   :  { %457 = vmatpush.msrb.mxu2 %v317_v46  ;;  %510 = vmatpush.msra.mxu3 %v427_v53  ;;  %v377_v60 = vld [vmem:[%s1692_s3 + $0x210] sm:$0xff]  ;;  %v343_v6 = vld [vmem:[%s1692_s3 + $0x100] sm:$0xff]  ;;  %v324_v33 = vld [vmem:[%s1692_s3 + $0x68] sm:$0xff] }
  0x3f   :  { %496 = vmatpush.msrb.mxu0 %v383_v48  ;;  %475 = vmatpush.msra.mxu1 %v353_v51  ;;  %v345_v2 = vld [vmem:[%s1692_s3 + $0x110] sm:$0xff]  ;;  %v419_v7 = vld [vmem:[%s1692_s3 + $0x360] sm:$0xff]  ;;  %v362_v34 = vld [vmem:[%s1692_s3 + $0x198] sm:$0xff] }
  0x40   :  { %458 = vmatpush.msrb.mxu2 %v315_v50  ;;  %511 = vmatpush.msra.mxu3 %v425_v59  ;;  %v421_v3 = vld [vmem:[%s1692_s3 + $0x370] sm:$0xff]  ;;  %v415_v15 = vld [vmem:[%s1692_s3 + $0x340] sm:$0xff]  ;;  %v438_v35 = vld [vmem:[%s1692_s3 + $0x3f8] sm:$0xff] }
  0x41   :  { %497 = vmatpush.msrb.mxu0 %v381_v52  ;;  %476 = vmatpush.msra.mxu1 %v351_v55  ;;  %v417_v11 = vld [vmem:[%s1692_s3 + $0x350] sm:$0xff]  ;;  %v411_v24 = vld [vmem:[%s1692_s3 + $0x320] sm:$0xff]  ;;  %v390_v36 = vld [vmem:[%s1692_s3 + $0x278] sm:$0xff] }
  0x42   :  { %459 = vmatpush.msrb.mxu2 %v313_v54  ;;  %512 = vmatpush.msra.mxu3 %v423_v63  ;;  %v413_v20 = vld [vmem:[%s1692_s3 + $0x330] sm:$0xff]  ;;  %v407_v32 = vld [vmem:[%s1692_s3 + $0x300] sm:$0xff]  ;;  %v322_v37 = vld [vmem:[%s1692_s3 + $0x58] sm:$0xff] }
  0x43   :  { %498 = vmatpush.msrb.mxu0 %v379_v56  ;;  %477 = vmatpush.msra.mxu1 %v349_v58  ;;  %v409_v28 = vld [vmem:[%s1692_s3 + $0x310] sm:$0xff]  ;;  %v360_v38 = vld [vmem:[%s1692_s3 + $0x188] sm:$0xff]  ;;  %v358_v42 = vld [vmem:[%s1692_s3 + $0x178] sm:$0xff] }
  0x44   :  { %460 = vmatpush.msrb.mxu2 %v311_v57  ;;  %513 = vmatpush.msra.mxu3 %v421_v3  ;;  %v436_v39 = vld [vmem:[%s1692_s3 + $0x3e8] sm:$0xff]  ;;  %v434_v43 = vld [vmem:[%s1692_s3 + $0x3d8] sm:$0xff]  ;;  %v1480_v56 = vld [vmem:[%s1691_s2] sm:$0xf] }
  0x45   :  { %499 = vmatpush.msrb.mxu0 %v377_v60  ;;  %478 = vmatpush.msra.mxu1 %v347_v62  ;;  %v388_v40 = vld [vmem:[%s1692_s3 + $0x268] sm:$0xff]  ;;  %v386_v44 = vld [vmem:[%s1692_s3 + $0x258] sm:$0xff] }
  0x46   :  { %525 = vmatpush.msra.mxu2 %v342_v61  ;;  %514 = vmatpush.msra.mxu3 %v419_v7  ;;  %v320_v41 = vld [vmem:[%s1692_s3 + $0x48] sm:$0xff]  ;;  %v318_v45 = vld [vmem:[%s1692_s3 + $0x38] sm:$0xff] }
  0x47   :  { %500 = vmatpush.msrb.mxu0 %v375_v0  ;;  %479 = vmatpush.msra.mxu1 %v345_v2  ;;  %v356_v46 = vld [vmem:[%s1692_s3 + $0x168] sm:$0xff]  ;;  %v354_v50 = vld [vmem:[%s1692_s3 + $0x158] sm:$0xff]  ;;  %v115_v2 = vperm.slane %v1480_v56, 0 }
  0x48   :  { %526 = vmatpush.msra.mxu2 %v340_v1  ;;  %515 = vmatpush.msra.mxu3 %v417_v11  ;;  %v432_v47 = vld [vmem:[%s1692_s3 + $0x3c8] sm:$0xff]  ;;  %v430_v51 = vld [vmem:[%s1692_s3 + $0x3b8] sm:$0xff] }
  0x49   :  { %565 = vmatpush.msra.mxu0 %v406_v4  ;;  %480 = vmatpush.msra.mxu1 %v343_v6  ;;  %v384_v48 = vld [vmem:[%s1692_s3 + $0x248] sm:$0xff]  ;;  %v382_v52 = vld [vmem:[%s1692_s3 + $0x238] sm:$0xff] }
  0x4a   :  { %527 = vmatpush.msra.mxu2 %v338_v5  ;;  %516 = vmatpush.msra.mxu3 %v415_v15  ;;  %v316_v49 = vld [vmem:[%s1692_s3 + $0x28] sm:$0xff]  ;;  %v314_v53 = vld [vmem:[%s1692_s3 + $0x18] sm:$0xff] }
  0x4b   :  { %566 = vmatpush.msra.mxu0 %v404_v8  ;;  %545 = vmatpush.msrb.mxu1 %v374_v10  ;;  %v352_v54 = vld [vmem:[%s1692_s3 + $0x148] sm:$0xff]  ;;  %v350_v60 = vld [vmem:[%s1692_s3 + $0x138] sm:$0xff]  ;;  %v117_v10 = vperm.slane %v1480_v56, 2 }
  0x4c   :  { %528 = vmatpush.msra.mxu2 %v336_v9  ;;  %517 = vmatpush.msra.mxu3 %v413_v20  ;;  %v428_v55 = vld [vmem:[%s1692_s3 + $0x3a8] sm:$0xff]  ;;  %v426_v61 = vld [vmem:[%s1692_s3 + $0x398] sm:$0xff] }
  0x4d   :  { %567 = vmatpush.msra.mxu0 %v402_v12  ;;  %546 = vmatpush.msrb.mxu1 %v372_v14  ;;  %v380_v57 = vld [vmem:[%s1692_s3 + $0x228] sm:$0xff]  ;;  %v378_v62 = vld [vmem:[%s1692_s3 + $0x218] sm:$0xff] }
  0x4e   :  { %529 = vmatpush.msra.mxu2 %v334_v13  ;;  %518 = vmatpush.msra.mxu3 %v411_v24  ;;  %v312_v59 = vld [vmem:[%s1692_s3 + $0x8] sm:$0xff]  ;;  %v346_v4 = vld [vmem:[%s1692_s3 + $0x118] sm:$0xff]  ;;  %v116_v13 = vperm.slane %v1480_v56, 1 }
  0x4f   :  { %568 = vmatpush.msra.mxu0 %v400_v17  ;;  %547 = vmatpush.msrb.mxu1 %v370_v19  ;;  %v348_v0 = vld [vmem:[%s1692_s3 + $0x128] sm:$0xff]  ;;  %v422_v5 = vld [vmem:[%s1692_s3 + $0x378] sm:$0xff] }
  0x50   :  { %530 = vmatpush.msra.mxu2 %v332_v18  ;;  %519 = vmatpush.msra.mxu3 %v409_v28  ;;  %v424_v1 = vld [vmem:[%s1692_s3 + $0x388] sm:$0xff]  ;;  %v418_v11 = vld [vmem:[%s1692_s3 + $0x358] sm:$0xff] }
  0x51   :  { %569 = vmatpush.msra.mxu0 %v398_v21  ;;  %548 = vmatpush.msrb.mxu1 %v368_v23  ;;  %v376_v3 = vld [vmem:[%s1692_s3 + $0x208] sm:$0xff]  ;;  %v414_v20 = vld [vmem:[%s1692_s3 + $0x338] sm:$0xff] }
  0x52   :  { %531 = vmatpush.msra.mxu2 %v330_v22  ;;  %520 = vmatpush.msra.mxu3 %v407_v32  ;;  %v344_v7 = vld [vmem:[%s1692_s3 + $0x108] sm:$0xff]  ;;  %v410_v28 = vld [vmem:[%s1692_s3 + $0x318] sm:$0xff] }
  0x53   :  { %570 = vmatpush.msra.mxu0 %v396_v25  ;;  %549 = vmatpush.msrb.mxu1 %v366_v27  ;;  %v420_v8 = vld [vmem:[%s1692_s3 + $0x368] sm:$0xff] }
  0x54   :  { %532 = vmatpush.msra.mxu2 %v328_v26  ;;  %585 = vmatpush.msrb.mxu3 %v438_v35  ;;  %v416_v14 = vld [vmem:[%s1692_s3 + $0x348] sm:$0xff] }
  0x55   :  { %571 = vmatpush.msra.mxu0 %v394_v29  ;;  %550 = vmatpush.msrb.mxu1 %v364_v31  ;;  %v412_v25 = vld [vmem:[%s1692_s3 + $0x328] sm:$0xff] }
  0x56   :  { %533 = vmatpush.msra.mxu2 %v326_v30  ;;  %586 = vmatpush.msrb.mxu3 %v436_v39  ;;  %v408_v31 = vld [vmem:[%s1692_s3 + $0x308] sm:$0xff] }
  0x57   :  { %572 = vmatpush.msra.mxu0 %v392_v16  ;;  %551 = vmatpush.msrb.mxu1 %v362_v34  ;;  %v118_v34 = vperm.slane %v1480_v56, 3  ;;  %v627_v56 = vld [vmem:[%s1694_s5 + $0x50] sm:$0xff] }
  0x58   :  { %534 = vmatpush.msra.mxu2 %v324_v33  ;;  %587 = vmatpush.msrb.mxu3 %v434_v43 }
  0x59   :  { %573 = vmatpush.msra.mxu0 %v390_v36  ;;  %552 = vmatpush.msrb.mxu1 %v360_v38 }
  0x5a   :  { %535 = vmatpush.msra.mxu2 %v322_v37  ;;  %588 = vmatpush.msrb.mxu3 %v432_v47 }
  0x5b   :  { %574 = vmatpush.msra.mxu0 %v388_v40  ;;  %553 = vmatpush.msrb.mxu1 %v358_v42 }
  0x5c   :  { %536 = vmatpush.msra.mxu2 %v320_v41  ;;  %589 = vmatpush.msrb.mxu3 %v430_v51  ;;  %v632_v51 = vld [vmem:[%s1694_s5 + $0x78] sm:$0xff] }
  0x5d   :  { %575 = vmatpush.msra.mxu0 %v386_v44  ;;  %554 = vmatpush.msrb.mxu1 %v356_v46 }
  0x5e   :  { %537 = vmatpush.msra.mxu2 %v318_v45  ;;  %590 = vmatpush.msrb.mxu3 %v428_v55  ;;  %v628_v55 = vld [vmem:[%s1694_s5 + $0x58] sm:$0xff] }
  0x5f   :  { %576 = vmatpush.msra.mxu0 %v384_v48  ;;  %555 = vmatpush.msrb.mxu1 %v354_v50 }
  0x60   :  { %538 = vmatpush.msra.mxu2 %v316_v49  ;;  %591 = vmatpush.msrb.mxu3 %v426_v61  ;;  %v623_v61 = vld [vmem:[%s1694_s5 + $0x30] sm:$0xff] }
  0x61   :  { %577 = vmatpush.msra.mxu0 %v382_v52  ;;  %556 = vmatpush.msrb.mxu1 %v352_v54  ;;  %v631_v52 = vld [vmem:[%s1694_s5 + $0x70] sm:$0xff]  ;;  %v629_v54 = vld [vmem:[%s1694_s5 + $0x60] sm:$0xff] }
  0x62   :  { %539 = vmatpush.msra.mxu2 %v314_v53  ;;  %592 = vmatpush.msrb.mxu3 %v424_v1  ;;  %v630_v53 = vld [vmem:[%s1694_s5 + $0x68] sm:$0xff]  ;;  %v621_v1 = vld [vmem:[%s1694_s5 + $0x20] sm:$0xff] }
  0x63   :  { %578 = vmatpush.msra.mxu0 %v380_v57  ;;  %557 = vmatpush.msrb.mxu1 %v350_v60  ;;  %v626_v57 = vld [vmem:[%s1694_s5 + $0x48] sm:$0xff]  ;;  %v644_v60 = vld [vmem:[%s1694_s5 + $0xd8] sm:$0xff] }
  0x64   :  { %540 = vmatpush.msra.mxu2 %v312_v59  ;;  %593 = vmatpush.msrb.mxu3 %v422_v5  ;;  %v624_v59 = vld [vmem:[%s1694_s5 + $0x38] sm:$0xff]  ;;  %v619_v5 = vld [vmem:[%s1694_s5 + $0x10] sm:$0xff] }
  0x65   :  { %579 = vmatpush.msra.mxu0 %v378_v62  ;;  %558 = vmatpush.msrb.mxu1 %v348_v0  ;;  %v643_v62 = vld [vmem:[%s1694_s5 + $0xd0] sm:$0xff]  ;;  %v642_v0 = vld [vmem:[%s1694_s5 + $0xc8] sm:$0xff] }
  0x66   :  { %594 = vmatpush.msrb.mxu3 %v420_v8  ;;  %v638_v8 = vld [vmem:[%s1694_s5 + $0xa8] sm:$0xff] }
  0x67   :  { %580 = vmatpush.msra.mxu0 %v376_v3  ;;  %559 = vmatpush.msrb.mxu1 %v346_v4  ;;  %v620_v3 = vld [vmem:[%s1694_s5 + $0x18] sm:$0xff] }
  0x68   :  { %595 = vmatpush.msrb.mxu3 %v418_v11  ;;  %v640_v4 = vld [vmem:[%s1694_s5 + $0xb8] sm:$0xff]  ;;  %v637_v11 = vld [vmem:[%s1694_s5 + $0xa0] sm:$0xff] }
  0x69   :  { %560 = vmatpush.msrb.mxu1 %v344_v7  ;;  %v618_v7 = vld [vmem:[%s1694_s5 + $0x8] sm:$0xff] }
  0x6a   :  { %596 = vmatpush.msrb.mxu3 %v416_v14 }
  0x6c   :  { %597 = vmatpush.msrb.mxu3 %v414_v20  ;;  %v633_v20 = vld [vmem:[%s1694_s5 + $0x80] sm:$0xff] }
  0x6e   :  { %598 = vmatpush.msrb.mxu3 %v412_v25 }
  0x70   :  { %599 = vmatpush.msrb.mxu3 %v410_v28 }
  0x72   :  { %600 = vmatpush.msrb.mxu3 %v408_v31 }
  0x8d   :  { %v204_v63 = vpop.f32.mrf.mxu3 }
  0x9b   :  { %v164_v58 = vpop.f32.mrf.mxu1 }
  0xa1   :  { %v144_v6 = vpop.f32.mrf.mxu0 }
  0xa2   :  { %v145_v9 = vadd.f32 %v144_v6, %v115_v2  ;;  %v641_v2 = vld [vmem:[%s1694_s5 + $0xc0] sm:$0xff]  ;;  %v639_v6 = vld [vmem:[%s1694_s5 + $0xb0] sm:$0xff] }
  0xa4   :  { %v165_v12 = vadd.f32 %v164_v58, %v145_v9  ;;  %v625_v58 = vld [vmem:[%s1694_s5 + $0x40] sm:$0xff] }
  0xa5   :  { %v224_v15 = vpop.f32.mrf.mxu1  ;;  %v244_v17 = vpop.f32.mrf.mxu3  ;;  %v439_v9 = vld [vmem:[%s1693_s4] sm:$0x3] }
  0xa6   :  { %v291_v18 = vmin.f32 %v165_v12, 0.0  ;;  %v225_v19 = vadd.f32 %v224_v15, %v117_v10  ;;  %vm287_vm1 = vcmp.gt.f32.partialorder %v165_v12, 0.0  ;;  %v617_v10 = vld [vmem:[%s1694_s5] sm:$0xff]  ;;  %v441_v14 = vperm.slane %v439_v9, 0  ;;  %v635_v15 = vld [vmem:[%s1694_s5 + $0x90] sm:$0xff] }
  0xa7   :  { %v184_v21 = vpop.f32.mrf.mxu2 }
  0xa8   :  { %v295_v22 = vmul.f32 1.442695, %v291_v18  ;;  %v245_v23 = vadd.f32 %v244_v17, %v225_v19  ;;  %v185_v24 = vadd.f32 %v184_v21, %v116_v13  ;;  %v636_v13 = vld [vmem:[%s1694_s5 + $0x98] sm:$0xff]  ;;  %v634_v17 = vld [vmem:[%s1694_s5 + $0x88] sm:$0xff] }
  0xa9   :  { %v710_v21 = vld [vmem:[%s1696_s7 + $0x58] sm:$0xff] }
  0xaa   :  { %v293_v26 = vmin.f32 %v245_v23, 0.0  ;;  %v205_v27 = vadd.f32 %v204_v63, %v185_v24  ;;  %812 = vpow2.f32 %v295_v22  ;;  %vm289_vm2 = vcmp.gt.f32.partialorder %v245_v23, 0.0  ;;  %v622_v63 = vld [vmem:[%s1694_s5 + $0x28] sm:$0xff]  ;;  %v709_v22 = vld [vmem:[%s1696_s7 + $0x50] sm:$0xff] }
  0xab   :  { %v442_v24 = vperm.slane %v439_v9, 1 }
  0xac   :  { %v299_v29 = vmul.f32 1.442695, %v293_v26  ;;  %v292_v30 = vmin.f32 %v205_v27, 0.0  ;;  %vm288_vm3 = vcmp.gt.f32.partialorder %v205_v27, 0.0 }
  0xad   :  { %v264_v32 = vpop.f32.mrf.mxu3 }
  0xae   :  { %814 = vpow2.f32 %v299_v29  ;;  %v297_v16 = vmul.f32 1.442695, %v292_v30  ;;  %v265_v38 = vadd.f32 %v264_v32, %v118_v34 }
  0xb0   :  { %v813_v33 = vpop.eup %812  ;;  %816 = vpow2.f32 %v297_v16 }
  0xb1   :  { %v797_v35 = vadd.f32 -1.0, %v813_v33 }
  0xb3   :  { %v307_v36 = vsel %vm287_vm1, %v165_v12, %v797_v35 }
  0xb4   :  { %v815_v37 = vpop.eup %814  ;;  %461 = vmatmul.f32.vlgmr.msrb.gmra.mxu2 %v307_v36 }
  0xb5   :  { %v284_v39 = vpop.f32.mrf.mxu3  ;;  %v799_v40 = vadd.f32 -1.0, %v815_v37  ;;  %653 = vmatpush.msrb.mxu2 %v632_v51  ;;  %v703_v51 = vld [vmem:[%s1696_s7 + $0x20] sm:$0xff] }
  0xb6   :  { %v817_v41 = vpop.eup %816  ;;  %v285_v42 = vadd.f32 %v284_v39, %v265_v38 }
  0xb7   :  { %v309_v43 = vsel %vm289_vm2, %v245_v23, %v799_v40  ;;  %v798_v44 = vadd.f32 -1.0, %v817_v41  ;;  %654 = vmatpush.msrb.mxu2 %v631_v52  ;;  %v702_v52 = vld [vmem:[%s1696_s7 + $0x18] sm:$0xff] }
  0xb8   :  { %v294_v45 = vmin.f32 %v285_v42, 0.0  ;;  %501 = vmatmul.f32.vlgmr.msrb.gmra.mxu0 %v309_v43  ;;  %vm290_vm4 = vcmp.gt.f32.partialorder %v285_v42, 0.0 }
  0xb9   :  { %v308_v46 = vsel %vm288_vm3, %v205_v27, %v798_v44  ;;  %655 = vmatpush.msrb.mxu2 %v630_v53  ;;  %722 = vmatpush.msrb.mxu0 %v710_v21  ;;  %v701_v53 = vld [vmem:[%s1696_s7 + $0x10] sm:$0xff] }
  0xba   :  { %v301_v47 = vmul.f32 1.442695, %v294_v45  ;;  %481 = vmatmul.f32.vlgmr.msra.gmra.mxu1 %v308_v46 }
  0xbb   :  { %656 = vmatpush.msrb.mxu2 %v629_v54  ;;  %677 = vmatpush.msra.mxu1 %v644_v60  ;;  %v700_v54 = vld [vmem:[%s1696_s7 + $0x8] sm:$0xff] }
  0xbc   :  { %818 = vpow2.f32 %v301_v47  ;;  %541 = vmatmul.f32.vlgmr.msra.gmra.mxu2 %v307_v36  ;;  %723 = vmatpush.msrb.mxu0 %v709_v22  ;;  %v707_v47 = vld [vmem:[%s1696_s7 + $0x40] sm:$0xff] }
  0xbd   :  { %657 = vmatpush.msrb.mxu2 %v628_v55  ;;  %678 = vmatpush.msra.mxu1 %v643_v62  ;;  %v699_v55 = vld [vmem:[%s1696_s7] sm:$0xff] }
  0xbf   :  { %658 = vmatpush.msrb.mxu2 %v627_v56  ;;  %679 = vmatpush.msra.mxu1 %v642_v0  ;;  %v809_v56 = vld [vmem:[%s1695_s6] ss:$0 sm:$0xff] }
  0xc0   :  { %581 = vmatmul.f32.vlgmr.msra.gmra.mxu0 %v309_v43 }
  0xc1   :  { %659 = vmatpush.msrb.mxu2 %v626_v57  ;;  %680 = vmatpush.msra.mxu1 %v641_v2  ;;  %v747_v2 = vld [vmem:[%s1698_s9 + $0x18] sm:$0xff] }
  0xc2   :  { %v819_v48 = vpop.eup %818  ;;  %561 = vmatmul.f32.vlgmr.msrb.gmra.mxu1 %v308_v46  ;;  %v708_v46 = vld [vmem:[%s1696_s7 + $0x48] sm:$0xff] }
  0xc3   :  { %v800_v49 = vadd.f32 -1.0, %v819_v48  ;;  %660 = vmatpush.msrb.mxu2 %v625_v58  ;;  %681 = vmatpush.msra.mxu1 %v640_v4  ;;  %v706_v48 = vld [vmem:[%s1696_s7 + $0x38] sm:$0xff]  ;;  %v745_v4 = vld [vmem:[%s1698_s9 + $0x8] sm:$0xff] }
  0xc4   :  { %724 = vmatpush.msrb.mxu0 %v708_v46 }
  0xc5   :  { %v310_v50 = vsel %vm290_vm4, %v285_v42, %v800_v49  ;;  %661 = vmatpush.msrb.mxu2 %v624_v59  ;;  %682 = vmatpush.msra.mxu1 %v639_v6  ;;  %v705_v49 = vld [vmem:[%s1696_s7 + $0x30] sm:$0xff]  ;;  %v810_v6 = vld [vmem:[%s1697_s8] ss:$0 sm:$0xff]  ;;  %s784_s8 = sshll.u32 %s1700_s11, 4  ;;  %s785_s8 = int_to_ptr.hbm [resolvable:$true] %s784_s8 }
  0xc6   :  { %521 = vmatmul.f32.vlgmr.msra.gmra.mxu3 %v310_v50  ;;  %725 = vmatpush.msrb.mxu0 %v707_v47 }
  0xc7   :  { %662 = vmatpush.msrb.mxu2 %v623_v61  ;;  %683 = vmatpush.msra.mxu1 %v638_v8 }
  0xc8   :  { %726 = vmatpush.msrb.mxu0 %v706_v48  ;;  %768 = vmatpush.msra.mxu3 %v747_v2 }
  0xc9   :  { %663 = vmatpush.msrb.mxu2 %v622_v63  ;;  %684 = vmatpush.msra.mxu1 %v637_v11 }
  0xca   :  { %727 = vmatpush.msrb.mxu0 %v705_v49 }
  0xcb   :  { %664 = vmatpush.msrb.mxu2 %v621_v1  ;;  %685 = vmatpush.msra.mxu1 %v636_v13 }
  0xcd   :  { %665 = vmatpush.msrb.mxu2 %v620_v3  ;;  %686 = vmatpush.msra.mxu1 %v635_v15  ;;  %v746_v3 = vld [vmem:[%s1698_s9 + $0x10] sm:$0xff] }
  0xce   :  { %601 = vmatmul.f32.vlgmr.msrb.gmra.mxu3 %v310_v50  ;;  %v704_v50 = vld [vmem:[%s1696_s7 + $0x28] sm:$0xff] }
  0xcf   :  { %666 = vmatpush.msrb.mxu2 %v619_v5  ;;  %687 = vmatpush.msra.mxu1 %v634_v17  ;;  %v744_v5 = vld [vmem:[%s1698_s9] sm:$0xff]  ;;  %s854_s9 = smov [#allocation2]  }
  0xd0   :  { %728 = vmatpush.msrb.mxu0 %v704_v50  ;;  %769 = vmatpush.msra.mxu3 %v746_v3  ;;  %s782_s15 = sshll.u32 %s854_s9, 4  ;;  %s783_s15 = int_to_ptr.vmem [resolvable:$true] %s782_s15 }
  0xd1   :  { %667 = vmatpush.msrb.mxu2 %v618_v7  ;;  %688 = vmatpush.msra.mxu1 %v633_v20 }
  0xd2   :  { %729 = vmatpush.msrb.mxu0 %v703_v51  ;;  %770 = vmatpush.msra.mxu3 %v745_v4 }
  0xd3   :  { %668 = vmatpush.msrb.mxu2 %v617_v10 }
  0xd4   :  { %730 = vmatpush.msrb.mxu0 %v702_v52  ;;  %771 = vmatpush.msra.mxu3 %v744_v5 }
  0xd6   :  { %731 = vmatpush.msrb.mxu0 %v701_v53 }
  0xd8   :  { %732 = vmatpush.msrb.mxu0 %v700_v54 }
  0xda   :  { %733 = vmatpush.msrb.mxu0 %v699_v55 }
 0x135   :  { %v502_v25 = vpop.f32.mrf.mxu0 }
 0x137   :  { %v462_v12 = vpop.f32.mrf.mxu2  ;;  %v482_v19 = vpop.f32.mrf.mxu1 }
 0x138   :  { %v463_v18 = vadd.f32 %v462_v12, %v441_v14  ;;  %v811_v14 = vld [vmem:[%s1699_s10] ss:$0 sm:$0xff] }
 0x13a   :  { %v483_v23 = vadd.f32 %v482_v19, %v463_v18 }
 0x13c   :  { %v503_v28 = vadd.f32 %v502_v25, %v483_v23 }
 0x13d   :  { %v582_v34 = vpop.f32.mrf.mxu0 }
 0x13f   :  { %v542_v26 = vpop.f32.mrf.mxu2  ;;  %v562_v31 = vpop.f32.mrf.mxu1 }
 0x140   :  { %v543_v27 = vadd.f32 %v542_v26, %v442_v24 }
 0x142   :  { %v563_v32 = vadd.f32 %v562_v31, %v543_v27 }
 0x144   :  { %v583_v35 = vadd.f32 %v582_v34, %v563_v32 }
 0x149   :  { %v522_v29 = vpop.f32.mrf.mxu3 }
 0x14a   :  { %v523_v30 = vadd.f32 %v522_v29, %v503_v28 }
 0x14c   :  { %v607_v16 = vmin.f32 %v523_v30, 0.0  ;;  %vm605_vm5 = vcmp.gt.f32.partialorder %v523_v30, 0.0 }
 0x14e   :  { %v609_v33 = vmul.f32 1.442695, %v607_v16 }
 0x150   :  { %820 = vpow2.f32 %v609_v33 }
 0x151   :  { %v602_v36 = vpop.f32.mrf.mxu3 }
 0x152   :  { %v603_v37 = vadd.f32 %v602_v36, %v583_v35 }
 0x154   :  { %v608_v38 = vmin.f32 %v603_v37, 0.0  ;;  %vm606_vm7 = vcmp.gt.f32.partialorder %v603_v37, 0.0 }
 0x156   :  { %v821_v39 = vpop.eup %820  ;;  %v611_v40 = vmul.f32 1.442695, %v608_v38 }
 0x157   :  { %v801_v41 = vadd.f32 -1.0, %v821_v39 }
 0x158   :  { %822 = vpow2.f32 %v611_v40 }
 0x159   :  { %v615_v42 = vsel %vm605_vm5, %v523_v30, %v801_v41 }
 0x15a   :  { %669 = vmatmul.f32.vlgmr.msrb.gmra.mxu2 %v615_v42 }
 0x15e   :  { %v823_v43 = vpop.eup %822 }
 0x15f   :  { %v802_v44 = vadd.f32 -1.0, %v823_v43 }
 0x161   :  { %v616_v45 = vsel %vm606_vm7, %v603_v37, %v802_v44 }
 0x162   :  { %803 = vmatmul.msk.f32.vlgmr.msra.gmra.mxu1 %vm649_vm6, %v616_v45 }
 0x1dd   :  { %v670_v57 = vpop.f32.mrf.mxu2 }
 0x1de   :  { %v671_v58 = vadd.f32 %v809_v56, %v670_v57 }
 0x1df   :  { %v690_v59 = vpop.f32.mrf.mxu1 }
 0x1e0   :  { %v691_v60 = vadd.f32 %v690_v59, %v671_v58 }
 0x1e2   :  { %v694_v61 = vmin.f32 %v691_v60, 0.0  ;;  %vm693_vm8 = vcmp.gt.f32.partialorder %v691_v60, 0.0 }
 0x1e4   :  { %v695_v62 = vmul.f32 1.442695, %v694_v61 }
 0x1e6   :  { %824 = vpow2.f32 %v695_v62 }
 0x1ec   :  { %v825_v63 = vpop.eup %824 }
 0x1ed   :  { %v804_v0 = vadd.f32 -1.0, %v825_v63 }
 0x1ef   :  { %v698_v1 = vsel %vm693_vm8, %v691_v60, %v804_v0 }
 0x1f0   :  { %805 = vmatmul.msk.f32.vlgmr.msrb.gmra.mxu0 %vm649_vm6, %v698_v1 }
 0x26d   :  { %v735_v7 = vpop.f32.mrf.mxu0 }
 0x26e   :  { %v736_v8 = vadd.f32 %v810_v6, %v735_v7 }
 0x270   :  { %v739_v9 = vmin.f32 %v736_v8, 0.0  ;;  %vm738_vm10 = vcmp.gt.f32.partialorder %v736_v8, 0.0 }
 0x272   :  { %v740_v10 = vmul.f32 1.442695, %v739_v9 }
 0x274   :  { %826 = vpow2.f32 %v740_v10 }
 0x27a   :  { %v827_v11 = vpop.eup %826 }
 0x27b   :  { %v806_v12 = vadd.f32 -1.0, %v827_v11 }
 0x27d   :  { %v743_v13 = vsel %vm738_vm10, %v736_v8, %v806_v12 }
 0x27e   :  { %807 = vmatmul.msk.f32.vlgmr.msra.gmra.mxu3 %vm752_vm9, %v743_v13 }
 0x301   :  { %v773_v15 = vpop.f32.mrf.mxu3 }
 0x302   :  { %v774_v17 = vadd.f32 %v811_v14, %v773_v15 }
 0x304   :  { %776 = vst [vmem:[#allocation2] sm:$0xff] %v774_v17 }
 0x305   :  { %787 = dma.vmem_to_hbm [thread:$0]  %s783_s15, 128, %s785_s8, [#allocation3]  }
 0x306   :  { %852 = dma.done.wait [#allocation3], 128  }
 0x307   :  { %853 = vsyncadd [#allocation3], 4294967168 }
 0x308   :  { %792 = vsyncpa [#allocation3], 1 }

</bundles_post_ra>
